<compile_context>
chip_gen: v7x
topology: tpu7x:2x2x1
jax: 0.10.0
libtpu: 0.0.40
codegen_flags: <defaults>
</compile_context>

<pallas_src>
import jax
import jax.numpy as jnp
from jax.experimental import pallas as pl
from jax.experimental.pallas import tpu as pltpu


def genre_encoder_kernel(idx_ref, tbl_ref, out_ref):
    # idx_ref: (TMP, P)        int32 — P genre ids per packed output row.
    # tbl_ref: (P*G, P*L)      f32   — block-diag fused table diag(emb@W+b, xP).
    # out_ref: (TMP, P*L)      f32   — lane-dense packed output (P*L == 128).
    idx = idx_ref[...]                                   # (TMP, P) int32
    rows, p = idx.shape
    pg = tbl_ref.shape[0]
    g = pg // p

    # Packed one-hot: one_hot[r, p_i*G + g_i] = (idx[r, p_i] == g_i).
    # Built with P static compares (VPU elementwise, P <= 8 here) — no
    # reshape/relayout, no gather.  Out-of-range ids give an all-zero row
    # (silent zero output instead of PyTorch's error/garbage gather).
    cols = jax.lax.broadcasted_iota(jnp.int32, (rows, pg), 1)
    one_hot = jnp.zeros((rows, pg), jnp.float32)
    for p_i in range(p):                                 # static unroll
        one_hot = one_hot + (idx[:, p_i:p_i + 1] + p_i * g == cols).astype(
            jnp.float32)

    # Gather + projection as ONE lane-dense MXU matmul against the fused
    # block-diagonal table; the store is a full-lane (128-wide) block.
    # TODO(synk): dropout is stochastic in train mode; eval-mode identity here.
    out_ref[...] = jnp.dot(one_hot, tbl_ref[...],
                           preferred_element_type=jnp.float32)


def genre_encoder_forward(indices, emb_table, w, b, *, tile_m=1024):
    """indices: (B,) int; emb_table: (G, H); w: (H, L); b: (L,) -> (B, L) f32."""
    B = indices.shape[0]
    G, H = emb_table.shape
    L = w.shape[1]

    # --- Hoisted fusion (review item 1): computed once by XLA in the wrapper;
    # the big emb/W tables never enter the kernel (and are not per-step inputs).
    proj_table = (emb_table.astype(jnp.float32) @ w.astype(jnp.float32)
                  + b.reshape(1, L).astype(jnp.float32))          # (G, L)

    # --- Lane-dense packing factor: pack rows so pack*L == 128 lanes.
    pack = 128 // L if (L <= 128 and 128 % L == 0) else 1
    align = max(8, pack)

    # --- Batch tiling: few large grid steps (review item 2). 1024 is a
    # multiple of 256 (v6e/v7x MXU pass) and of 128 (v5e).
    if B >= tile_m:
        tm = (tile_m // align) * align
    else:
        tm = align * ((B + align - 1) // align)
    tm = max(align, tm)
    b_pad = ((B + tm - 1) // tm) * tm

    idx = indices.astype(jnp.int32)
    if b_pad != B:
        idx = jnp.pad(idx, (0, b_pad - B))   # padded rows use genre 0, sliced off
    idx2d = idx.reshape(b_pad // pack, pack)

    # Block-diagonal fused table: kron(I_pack, proj_table) -> (pack*G, pack*L).
    # Tiny (e.g. 80x128 f32 = 40 KiB), resident in VMEM every step.
    block_table = jnp.kron(jnp.eye(pack, dtype=jnp.float32), proj_table)

    tmp = tm // pack                         # packed rows per grid step
    out_packed = pl.pallas_call(
        genre_encoder_kernel,
        out_shape=jax.ShapeDtypeStruct((b_pad // pack, pack * L), jnp.float32),
        grid=(b_pad // tm,),
        in_specs=[
            pl.BlockSpec((tmp, pack), lambda i: (i, 0)),           # genre ids
            pl.BlockSpec((pack * G, pack * L), lambda i: (0, 0)),  # fused table
        ],
        out_specs=pl.BlockSpec((tmp, pack * L), lambda i: (i, 0)),
        compiler_params=pltpu.CompilerParams(
            dimension_semantics=("parallel",),   # batch tiles are independent
        ),
    )(idx2d, block_table)

    return out_packed.reshape(b_pad, L)[:B]


if __name__ == "__main__":
    # Small, deterministic setup consistent with the module's __init__.
    num_genres = 10
    hidden_dim = 32
    latent_dim = 16
    batch = 4

    key = jax.random.PRNGKey(0)
    k_emb, k_w, k_b, k_idx = jax.random.split(key, 4)

    emb_table = jax.random.normal(k_emb, (num_genres, hidden_dim), jnp.float32) * 0.02
    # PyTorch nn.Linear weight is (latent, hidden); store transposed for x @ W.
    w = jax.random.normal(k_w, (hidden_dim, latent_dim), jnp.float32) * 0.02
    b = jax.random.normal(k_b, (latent_dim,), jnp.float32) * 0.02
    indices = jax.random.randint(k_idx, (batch,), 0, num_genres, jnp.int32)

    out = genre_encoder_forward(indices, emb_table, w, b)
    out = jax.block_until_ready(out)

    ref = emb_table[indices] @ w + b          # eval-mode reference (dropout = id)
    assert out.shape == (batch, latent_dim), out.shape
    assert jnp.allclose(out, ref, atol=1e-5, rtol=1e-4), "mismatch vs reference"

    print("KERNEL_OK")
</pallas_src>

<mosaic_0001>
module attributes {stable_mosaic.version = 11 : i64} {
  func.func @genre_encoder_kernel(%arg0: i32, %arg1: memref<1x8xi32, #tpu.memory_space<vmem>>, %arg2: memref<80x128xf32, #tpu.memory_space<vmem>>, %arg3: memref<1x128xf32, #tpu.memory_space<vmem>>) attributes {dimension_semantics = [#tpu.dimension_semantics<parallel>], iteration_bounds = array<i64: 1>, scalar_prefetch = 0 : i64, scratch_operands = 0 : i64, tpu.core_type = #tpu.core_type<tc>, window_params = [{transform_indices = @transform_0, window_bounds = array<i64: 1, 8>}, {pipeline_mode = #tpu.pipeline_mode<synchronous>, transform_indices = @transform_1, window_bounds = array<i64: 80, 128>}, {transform_indices = @transform_2, window_bounds = array<i64: 1, 128>}]} {
    %c0 = arith.constant 0 : index
    %c0_0 = arith.constant 0 : index
    %0 = vector.load %arg1[%c0, %c0_0] : memref<1x8xi32, #tpu.memory_space<vmem>>, vector<1x8xi32>
    %1 = tpu.iota {dimensions = array<i32: 1>} : vector<1x80xi32>
    %cst = arith.constant 0.000000e+00 : f32
    %2 = vector.broadcast %cst : f32 to vector<1x80xf32>
    %3 = vector.extract_strided_slice %0 {offsets = [0, 0], sizes = [1, 1], strides = [1, 1]} : vector<1x8xi32> to vector<1x1xi32>
    %c0_i32 = arith.constant 0 : i32
    %4 = vector.broadcast %c0_i32 : i32 to vector<1x1xi32>
    %5 = arith.addi %3, %4 : vector<1x1xi32>
    %6 = vector.broadcast %5 : vector<1x1xi32> to vector<1x80xi32>
    %7 = arith.cmpi eq, %6, %1 : vector<1x80xi32>
    %8 = arith.extui %7 : vector<1x80xi1> to vector<1x80xi32>
    %9 = arith.sitofp %8 : vector<1x80xi32> to vector<1x80xf32>
    %10 = arith.addf %2, %9 : vector<1x80xf32>
    %11 = vector.extract_strided_slice %0 {offsets = [0, 1], sizes = [1, 1], strides = [1, 1]} : vector<1x8xi32> to vector<1x1xi32>
    %c10_i32 = arith.constant 10 : i32
    %12 = vector.broadcast %c10_i32 : i32 to vector<1x1xi32>
    %13 = arith.addi %11, %12 : vector<1x1xi32>
    %14 = vector.broadcast %13 : vector<1x1xi32> to vector<1x80xi32>
    %15 = arith.cmpi eq, %14, %1 : vector<1x80xi32>
    %16 = arith.extui %15 : vector<1x80xi1> to vector<1x80xi32>
    %17 = arith.sitofp %16 : vector<1x80xi32> to vector<1x80xf32>
    %18 = arith.addf %10, %17 : vector<1x80xf32>
    %19 = vector.extract_strided_slice %0 {offsets = [0, 2], sizes = [1, 1], strides = [1, 1]} : vector<1x8xi32> to vector<1x1xi32>
    %c20_i32 = arith.constant 20 : i32
    %20 = vector.broadcast %c20_i32 : i32 to vector<1x1xi32>
    %21 = arith.addi %19, %20 : vector<1x1xi32>
    %22 = vector.broadcast %21 : vector<1x1xi32> to vector<1x80xi32>
    %23 = arith.cmpi eq, %22, %1 : vector<1x80xi32>
    %24 = arith.extui %23 : vector<1x80xi1> to vector<1x80xi32>
    %25 = arith.sitofp %24 : vector<1x80xi32> to vector<1x80xf32>
    %26 = arith.addf %18, %25 : vector<1x80xf32>
    %27 = vector.extract_strided_slice %0 {offsets = [0, 3], sizes = [1, 1], strides = [1, 1]} : vector<1x8xi32> to vector<1x1xi32>
    %c30_i32 = arith.constant 30 : i32
    %28 = vector.broadcast %c30_i32 : i32 to vector<1x1xi32>
    %29 = arith.addi %27, %28 : vector<1x1xi32>
    %30 = vector.broadcast %29 : vector<1x1xi32> to vector<1x80xi32>
    %31 = arith.cmpi eq, %30, %1 : vector<1x80xi32>
    %32 = arith.extui %31 : vector<1x80xi1> to vector<1x80xi32>
    %33 = arith.sitofp %32 : vector<1x80xi32> to vector<1x80xf32>
    %34 = arith.addf %26, %33 : vector<1x80xf32>
    %35 = vector.extract_strided_slice %0 {offsets = [0, 4], sizes = [1, 1], strides = [1, 1]} : vector<1x8xi32> to vector<1x1xi32>
    %c40_i32 = arith.constant 40 : i32
    %36 = vector.broadcast %c40_i32 : i32 to vector<1x1xi32>
    %37 = arith.addi %35, %36 : vector<1x1xi32>
    %38 = vector.broadcast %37 : vector<1x1xi32> to vector<1x80xi32>
    %39 = arith.cmpi eq, %38, %1 : vector<1x80xi32>
    %40 = arith.extui %39 : vector<1x80xi1> to vector<1x80xi32>
    %41 = arith.sitofp %40 : vector<1x80xi32> to vector<1x80xf32>
    %42 = arith.addf %34, %41 : vector<1x80xf32>
    %43 = vector.extract_strided_slice %0 {offsets = [0, 5], sizes = [1, 1], strides = [1, 1]} : vector<1x8xi32> to vector<1x1xi32>
    %c50_i32 = arith.constant 50 : i32
    %44 = vector.broadcast %c50_i32 : i32 to vector<1x1xi32>
    %45 = arith.addi %43, %44 : vector<1x1xi32>
    %46 = vector.broadcast %45 : vector<1x1xi32> to vector<1x80xi32>
    %47 = arith.cmpi eq, %46, %1 : vector<1x80xi32>
    %48 = arith.extui %47 : vector<1x80xi1> to vector<1x80xi32>
    %49 = arith.sitofp %48 : vector<1x80xi32> to vector<1x80xf32>
    %50 = arith.addf %42, %49 : vector<1x80xf32>
    %51 = vector.extract_strided_slice %0 {offsets = [0, 6], sizes = [1, 1], strides = [1, 1]} : vector<1x8xi32> to vector<1x1xi32>
    %c60_i32 = arith.constant 60 : i32
    %52 = vector.broadcast %c60_i32 : i32 to vector<1x1xi32>
    %53 = arith.addi %51, %52 : vector<1x1xi32>
    %54 = vector.broadcast %53 : vector<1x1xi32> to vector<1x80xi32>
    %55 = arith.cmpi eq, %54, %1 : vector<1x80xi32>
    %56 = arith.extui %55 : vector<1x80xi1> to vector<1x80xi32>
    %57 = arith.sitofp %56 : vector<1x80xi32> to vector<1x80xf32>
    %58 = arith.addf %50, %57 : vector<1x80xf32>
    %59 = vector.extract_strided_slice %0 {offsets = [0, 7], sizes = [1, 1], strides = [1, 1]} : vector<1x8xi32> to vector<1x1xi32>
    %c70_i32 = arith.constant 70 : i32
    %60 = vector.broadcast %c70_i32 : i32 to vector<1x1xi32>
    %61 = arith.addi %59, %60 : vector<1x1xi32>
    %62 = vector.broadcast %61 : vector<1x1xi32> to vector<1x80xi32>
    %63 = arith.cmpi eq, %62, %1 : vector<1x80xi32>
    %64 = arith.extui %63 : vector<1x80xi1> to vector<1x80xi32>
    %65 = arith.sitofp %64 : vector<1x80xi32> to vector<1x80xf32>
    %66 = arith.addf %58, %65 : vector<1x80xf32>
    %c0_1 = arith.constant 0 : index
    %c0_2 = arith.constant 0 : index
    %67 = vector.load %arg2[%c0_1, %c0_2] : memref<80x128xf32, #tpu.memory_space<vmem>>, vector<80x128xf32>
    %cst_3 = arith.constant dense<0.000000e+00> : vector<1x128xf32>
    %68 = tpu.matmul %66, %67, %cst_3 {dimension_numbers = #tpu.dot_dimension_numbers<[1], [0], [0], [1], [0, 0, 1, 1], [], []>} : vector<1x80xf32>, vector<80x128xf32>, vector<1x128xf32> -> vector<1x128xf32>
    %c0_4 = arith.constant 0 : index
    %c0_5 = arith.constant 0 : index
    %69 = vector.load %arg3[%c0_4, %c0_5] : memref<1x128xf32, #tpu.memory_space<vmem>>, vector<1x128xf32>
    tpu.vector_store %arg3[%c0_4, %c0_5], %68 {strides = array<i32>} : memref<1x128xf32, #tpu.memory_space<vmem>>, vector<1x128xf32>,
    return
  }
  func.func @transform_0(%arg0: i32) -> (i32, i32) {
    %c0_i32 = arith.constant 0 : i32
    %c0_i32_0 = arith.constant 0 : i32
    return %arg0, %c0_i32 : i32, i32
  }
  func.func @transform_1(%arg0: i32) -> (i32, i32) {
    %c0_i32 = arith.constant 0 : i32
    %c0_i32_0 = arith.constant 0 : i32
    %c0_i32_1 = arith.constant 0 : i32
    return %c0_i32, %c0_i32_0 : i32, i32
  }
  func.func @transform_2(%arg0: i32) -> (i32, i32) {
    %c0_i32 = arith.constant 0 : i32
    %c0_i32_0 = arith.constant 0 : i32
    return %arg0, %c0_i32 : i32, i32
  }
}

</mosaic_0001>

<bundles_post_ra>
// kernel: tpu_custom_call.1
= control target key start
LH: loop header
LB: loop body
LE: loop exit
PB: predicated region body
PF: predicated region fallthrough
CT: control target
= control target key end

     0   :  { %7 = vsyncpa [#allocation3], 0  ;;  %s466_s0 = inlined_call_operand.hbm [shape: s32[1,8], index: 0, kind: input, shape index: {}]   ;;  %s467_s1 = inlined_call_operand.hbm [shape: f32[80,128], index: 1, kind: input, shape index: {}]   ;;  %s468_s2 = inlined_call_operand.hbm [shape: f32[1,128], index: 2, kind: output, shape index: {}]  }
   0x1   :  { %8 = vsyncpa [#allocation6], 0 }
   0x2   :  { %9 = vsyncpa [#allocation4], 0  ;;  %s392_s9 = smov [#allocation2]   ;;  %s393_s11 = smov [#allocation5]  }
   0x3   :  { %s16_s10 = sshll.u32 %s392_s9, 4  ;;  %s25_s12 = sshll.u32 %s393_s11, 4  ;;  %s17_s10 = int_to_ptr.vmem [resolvable:$true] %s16_s10  ;;  %s423_s12 = int_to_ptr.vmem [resolvable:$true] %s25_s12 }
   0x4   :  { %s320_s15 = scalar_lea.hbm %s466_s0, 16 }
   0x5   :  { %p321_p0 = scmp.ne.s32.totalorder %s466_s0, %s320_s15  ;;  %p324_p1 = scmp.lt.u32.totalorder %s320_s15, %s466_s0 }
   0x7   :  { %p326_p2 = pnand %p324_p1, %p321_p0 }
   0x9   :  { %329 = shalt.err (!%p326_p2)
}
   0xa   :  { %s330_s20 = scalar_lea.vmem %s17_s10, 16  ;;  %s334_s21 = scalar_lea.vmem %s17_s10, 32 }
   0xb   :  { %p331_p3 = scmp.ne.s32.totalorder %s17_s10, %s330_s20  ;;  %p335_p4 = scmp.lt.s32.totalorder %s17_s10, %s17_s10 }
   0xc   :  { %p336_p5 = scmp.lt.s32.totalorder %s334_s21, %s330_s20 }
   0xe   :  { %p337_p6 = por %p336_p5, %p335_p4 }
  0x10   :  { %p338_p7 = pnand %p337_p6, %p331_p3 }
  0x12   :  { %341 = shalt.err (!%p338_p7)
}
  0x13   :  { %19 = dma.hbm_to_vmem [thread:$0]  %s466_s0, 16, %s17_s10, [#allocation3]  }
  0x14   :  { %s342_s26 = scalar_lea.hbm %s467_s1, 1280 }
  0x15   :  { %p343_p8 = scmp.ne.s32.totalorder %s467_s1, %s342_s26  ;;  %p346_p9 = scmp.lt.u32.totalorder %s342_s26, %s467_s1 }
  0x17   :  { %p348_p10 = pnand %p346_p9, %p343_p8 }
  0x19   :  { %351 = shalt.err (!%p348_p10)
}
  0x1a   :  { %s352_s3 = scalar_lea.vmem %s423_s12, 1280  ;;  %p357_p12 = scmp.lt.s32.totalorder %s423_s12, %s423_s12 }
  0x1b   :  { %p353_p11 = scmp.ne.s32.totalorder %s423_s12, %s352_s3  ;;  %p358_p13 = scmp.lt.s32.totalorder %s352_s3, %s352_s3 }
  0x1d   :  { %p359_p0 = por %p358_p13, %p357_p12 }
  0x1f   :  { %p360_p1 = pnand %p359_p0, %p353_p11 }
  0x21   :  { %363 = shalt.err (!%p360_p1)
}
  0x22   :  { %s394_s0 = smov 128   ;;  %s395_s4 = smov 8  }
  0x23   :  { %31 = dma.hbm_to_vmem [thread:$0]  %s467_s1, 1280, %s423_s12, [#allocation6], %s394_s0, %s394_s0, %s395_s4  }
  0x24   :  { %386 = dma.done.wait [#allocation3], 16  }
  0x25   :  { %387 = vsyncadd [#allocation3], 4294967280 }
  0x26   :  { %388 = dma.done.wait [#allocation6], 1280  }
  0x27   :  { %389 = vsyncadd [#allocation6], 4294966016  ;;  %v396_v0 = vmov 0   ;;  %v397_v1 = vmov 2   ;;  %v38_v2 = vld [vmem:[#allocation2] sm:$0x1]  ;;  %v39_v33 = vlaneseq }
  0x28   :  { %311 = vset.pattern.permute.xlu0 %v396_v0  ;;  %313 = vset.pattern.permute.xlu1 %v397_v1  ;;  %v64_v3 = vadd.s32 20, %v38_v2  ;;  %v52_v4 = vadd.s32 10, %v38_v2  ;;  %v76_v5 = vadd.s32 30, %v38_v2  ;;  %v398_v6 = vmov 1   ;;  %v136_v9 = vld [vmem:[#allocation5] sm:$0xff]  ;;  %v137_v10 = vld [vmem:[#allocation5 + $0x8] sm:$0xff] }
  0x29   :  { %42 = vperm.xlu0 %311, %v38_v2   ;;  %v399_v7 = vmov 3   ;;  %v100_v8 = vadd.s32 50, %v38_v2  ;;  %v281_v11 = vpack.c.bf16 %v137_v10, %v136_v9  ;;  %v88_v12 = vadd.s32 40, %v38_v2  ;;  %v138_v15 = vld [vmem:[#allocation5 + $0x10] sm:$0xff]  ;;  %v139_v16 = vld [vmem:[#allocation5 + $0x18] sm:$0xff]  ;;  %v140_v20 = vld [vmem:[#allocation5 + $0x20] sm:$0xff] }
  0x2a   :  { %66 = vperm.xlu1 %313, %v64_v3   ;;  %v400_v13 = vmov 0.0|0.0   ;;  %v401_v14 = vmov 5   ;;  %v402_v17 = vmov 4   ;;  %v284_v18 = vpack.c.bf16 %v139_v16, %v138_v15  ;;  %v141_v21 = vld [vmem:[#allocation5 + $0x28] sm:$0xff]  ;;  %v142_v26 = vld [vmem:[#allocation5 + $0x30] sm:$0xff]  ;;  %v143_v27 = vld [vmem:[#allocation5 + $0x38] sm:$0xff] }
  0x2b   :  { %280 = vmatprep.subr.bf16.mxu0 %v400_v13  ;;  %v112_v19 = vadd.s32 60, %v38_v2  ;;  %v403_v22 = vmov 7   ;;  %v287_v23 = vpack.c.bf16 %v141_v21, %v140_v20  ;;  %v404_v24 = vmov 6   ;;  %v144_v29 = vld [vmem:[#allocation5 + $0x40] sm:$0xff]  ;;  %v145_v30 = vld [vmem:[#allocation5 + $0x48] sm:$0xff]  ;;  %s407_s1 = smov [#allocation7]  }
  0x2c   :  { %282 = vmatpush3.bf16.msra.mxu0 %v281_v11  ;;  %v124_v25 = vadd.s32 70, %v38_v2  ;;  %v290_v28 = vpack.c.bf16 %v143_v27, %v142_v26  ;;  %v293_v31 = vpack.c.bf16 %v145_v30, %v144_v29  ;;  %vm405_vm0 = vmmov 0   ;;  %s227_s7 = sshll.u32 %s407_s1, 4  ;;  %s228_s7 = int_to_ptr.vmem [resolvable:$true] %s227_s7 }
  0x2d   :  { %312 = vset.pattern.permute.xlu0 %v398_v6  ;;  %283 = vmatprep.subr.bf16.mxu0 %v400_v13  ;;  %v406_v32 = vmov 0.0   ;;  %v45_v34 = vshrl.u32 %v39_v33, 7  ;;  %v40_v38 = vand.u32 127, %v39_v33  ;;  %vm146_vm9 = vcmask 654336   ;;  %s364_s8 = scalar_lea.vmem %s228_s7, 16  ;;  %s368_s9 = scalar_lea.vmem %s228_s7, 32 }
  0x2e   :  { %54 = vperm.xlu0 %312, %v52_v4   ;;  %314 = vset.pattern.permute.xlu1 %v399_v7  ;;  %p365_p2 = scmp.ne.s32.totalorder %s228_s7, %s364_s8  ;;  %p369_p3 = scmp.lt.s32.totalorder %s228_s7, %s228_s7 }
  0x2f   :  { %78 = vperm.xlu1 %314, %v76_v5   ;;  %277 = vmatprep.mubr.msk.f32.mxu0 %vm405_vm0, %v406_v32  ;;  %v46_v35 = vsub.s32 0, %v45_v34  ;;  %p370_p4 = scmp.lt.s32.totalorder %s368_s9, %s364_s8 }
  0x30   :  { %285 = vmatpush3.bf16.msra.mxu0 %v284_v18 }
  0x31   :  { %286 = vmatprep.subr.bf16.mxu0 %v400_v13  ;;  %p371_p5 = por %p370_p4, %p369_p3 }
  0x32   :  { %316 = vset.pattern.permute.xlu0 %v401_v14 }
  0x33   :  { %102 = vperm.xlu0 %316, %v100_v8   ;;  %315 = vset.pattern.permute.xlu1 %v402_v17  ;;  %p372_p6 = pnand %p371_p5, %p365_p2 }
  0x34   :  { %90 = vperm.xlu1 %315, %v88_v12   ;;  %288 = vmatpush3.bf16.msra.mxu0 %v287_v23 }
  0x35   :  { %289 = vmatprep.subr.bf16.mxu0 %v400_v13 }
  0x37   :  { %319 = vset.pattern.permute.xlu0 %v403_v22 }
  0x38   :  { %317 = vset.pattern.permute.xlu1 %v404_v24  ;;  %291 = vmatpush3.bf16.msra.mxu0 %v290_v28 }
  0x39   :  { %114 = vperm.xlu1 %317, %v112_v19   ;;  %292 = vmatprep.subr.bf16.mxu0 %v400_v13 }
  0x3c   :  { %294 = vmatpush3.bf16.msra.mxu0 %v293_v31 }
  0x3d   :  { %318 = vset.pattern.permute.xlu1 %v403_v22 }
  0x3e   :  { %126 = vperm.xlu1 %318, %v124_v25  }
  0xa8   :  { %v43_v36 = vpop.permute.xlu0 %42 }
  0xa9   :  { %v47_v37 = vrot.slane %v43_v36, %v46_v35  ;;  %v67_v39 = vpop.permute.xlu1 %66 }
  0xaa   :  { %v71_v40 = vrot.slane %v67_v39, %v46_v35 }
  0xab   :  { %vm48_vm1 = vcmp.eq.s32.totalorder %v47_v37, %v40_v38 }
  0xac   :  { %v237_v43 = vsel %vm48_vm1, 1.0, %v406_v32  ;;  %vm72_vm2 = vcmp.eq.s32.totalorder %v71_v40, %v40_v38 }
  0xad   :  { %v55_v41 = vpop.permute.xlu0 %54  ;;  %v239_v49 = vsel %vm72_vm2, 1.0, %v406_v32 }
  0xae   :  { %v59_v42 = vrot.slane %v55_v41, %v46_v35  ;;  %v79_v44 = vpop.permute.xlu1 %78 }
  0xaf   :  { %v83_v45 = vrot.slane %v79_v44, %v46_v35 }
  0xb0   :  { %vm60_vm3 = vcmp.eq.s32.totalorder %v59_v42, %v40_v38 }
  0xb1   :  { %v238_v46 = vsel %vm60_vm3, 1.0, %v406_v32  ;;  %vm84_vm4 = vcmp.eq.s32.totalorder %v83_v45, %v40_v38 }
  0xb2   :  { %v63_v47 = vadd.f32 %v238_v46, %v237_v43  ;;  %v103_v48 = vpop.permute.xlu0 %102  ;;  %v240_v53 = vsel %vm84_vm4, 1.0, %v406_v32 }
  0xb3   :  { %v107_v50 = vrot.slane %v103_v48, %v46_v35  ;;  %v91_v52 = vpop.permute.xlu1 %90 }
  0xb4   :  { %v75_v51 = vadd.f32 %v239_v49, %v63_v47  ;;  %v95_v54 = vrot.slane %v91_v52, %v46_v35 }
  0xb5   :  { %vm108_vm6 = vcmp.eq.s32.totalorder %v107_v50, %v40_v38 }
  0xb6   :  { %v87_v55 = vadd.f32 %v240_v53, %v75_v51  ;;  %vm96_vm5 = vcmp.eq.s32.totalorder %v95_v54, %v40_v38  ;;  %v242_v59 = vsel %vm108_vm6, 1.0, %v406_v32 }
  0xb7   :  { %v241_v56 = vsel %vm96_vm5, 1.0, %v406_v32 }
  0xb8   :  { %v99_v57 = vadd.f32 %v241_v56, %v87_v55  ;;  %v115_v58 = vpop.permute.xlu1 %114 }
  0xb9   :  { %v119_v60 = vrot.slane %v115_v58, %v46_v35 }
  0xba   :  { %v111_v61 = vadd.f32 %v242_v59, %v99_v57 }
  0xbb   :  { %vm120_vm7 = vcmp.eq.s32.totalorder %v119_v60, %v40_v38 }
  0xbc   :  { %v243_v62 = vsel %vm120_vm7, 1.0, %v406_v32 }
  0xbd   :  { %v127_v63 = vpop.permute.xlu1 %126  ;;  %v123_v1 = vadd.f32 %v243_v62, %v111_v61 }
  0xbe   :  { %v131_v0 = vrot.slane %v127_v63, %v46_v35 }
  0xc0   :  { %vm132_vm8 = vcmp.eq.s32.totalorder %v131_v0, %v40_v38 }
  0xc1   :  { %v244_v2 = vsel %vm132_vm8, 1.0, %v406_v32 }
  0xc2   :  { %v135_v3 = vadd.f32 %v244_v2, %v123_v1 }
  0xc4   :  { %278 = vmatmul.mubr.msk.f32.vlgmr.msra.gmra.mrb[0].mxu0 %vm146_vm9, %v135_v3 }
 0x197   :  { %v216_v4 = vpop.f32.mrb[0].mxu0 }
 0x198   :  { %220 = vst [vmem:[#allocation7] sm:$0x1] %v216_v4  ;;  %v279_v5 = vpop.f32.mrb[1].mxu0 }
 0x199   :  { %375 = shalt.err (!%p372_p6)
}
 0x19a   :  { %s376_s12 = scalar_lea.hbm %s468_s2, 16 }
 0x19b   :  { %p377_p7 = scmp.ne.s32.totalorder %s468_s2, %s376_s12  ;;  %p380_p8 = scmp.lt.u32.totalorder %s376_s12, %s468_s2 }
 0x19d   :  { %p382_p9 = pnand %p380_p8, %p377_p7 }
 0x19f   :  { %385 = shalt.err (!%p382_p9)
}
 0x1a0   :  { %230 = dma.vmem_to_hbm [thread:$0]  %s228_s7, 16, %s468_s2, [#allocation4]  }
 0x1a1   :  { %390 = dma.done.wait [#allocation4], 16  }
 0x1a2   :  { %391 = vsyncadd [#allocation4], 4294967280 }
 0x1a3   :  { %234 = vsyncpa [#allocation3], 1 }
 0x1a4   :  { %235 = vsyncpa [#allocation6], 1 }
 0x1a5   :  { %236 = vsyncpa [#allocation4], 1 }

</bundles_post_ra>
